<compile_context>
chip_gen: v7x
topology: tpu7x:2x2x1
jax: 0.10.0
libtpu: 0.0.40
codegen_flags: <defaults>
</compile_context>

<pallas_src>
import functools

import jax
import jax.numpy as jnp
from jax import lax
from jax.experimental import pallas as pl
from jax.experimental.pallas import tpu as pltpu

_LANES = 128
_ACC_ROWS = 8           # one f32 vreg: (8, 128)
_MAX_TILE_ROWS = 2048   # 1 MiB f32 per input block; 2 inputs x 2 bufs = 4 MiB VMEM
_NUM_CORES = 2          # leading "parallel" axis: 2 TCs on v7x, serial loop on v5e/v6e


def _charbonnier_partial_kernel(eps_ref, x_ref, y_ref, out_ref, *,
                                tile_rows, blocks_per_core, rows_valid):
    """Accumulates sum of sqrt(diff^2 + eps^2) into a per-core (8,128) block.

    eps_ref       : (1,) f32 in SMEM
    x_ref / y_ref : (tile_rows, 128) input tiles (native dtype, upcast here)
    out_ref       : (8, 128) f32 output block, resident across the reduction
                    axis (its index_map is constant along grid axis 1).
    """
    c = pl.program_id(0)
    i = pl.program_id(1)

    @pl.when(i == 0)
    def _():
        out_ref[...] = jnp.zeros_like(out_ref)

    eps = eps_ref[0]
    # TODO(synk): for bf16 inputs on v6e/v7x the subtraction could stay in bf16
    # to shave VALU ops; kept in f32 for exact parity with the PyTorch module.
    d = x_ref[...].astype(jnp.float32) - y_ref[...].astype(jnp.float32)
    val = jnp.sqrt(d * d + eps * eps)                       # (tile_rows, 128)

    # Nominal (unclamped) block index of this grid slot and its first row.
    row0 = (c * blocks_per_core + i) * tile_rows
    is_full = row0 + tile_rows <= rows_valid                # rows_valid is static

    @pl.when(is_full)
    def _():
        # Fold (tile_rows,128) -> (8,128): layout-preserving reshape + VPU adds.
        out_ref[...] += val.reshape(-1, _ACC_ROWS, _LANES).sum(axis=0)

    @pl.when(jnp.logical_not(is_full))
    def _():
        # Boundary (or clamped out-of-range) block: mask rows beyond the data.
        rid = row0 + lax.broadcasted_iota(jnp.int32, val.shape, 0)
        masked = jnp.where(rid < rows_valid, val, 0.0)
        out_ref[...] += masked.reshape(-1, _ACC_ROWS, _LANES).sum(axis=0)


def charbonnier_loss(x, y, eps=1e-3):
    assert x.shape == y.shape
    n = x.size
    if n == 0:
        return jnp.float32(jnp.nan)   # matches torch.mean over an empty tensor

    xf = x.reshape(-1)
    yf = y.reshape(-1)

    # Pad only the final partial row (n % 128 != 0); the common aligned case
    # needs no copy at all -- the ragged *block* tail is masked in-kernel.
    lane_pad = (-n) % _LANES
    if lane_pad:
        # TODO(synk): this rare path still copies both inputs; the <128-element
        # tail could instead be summed in plain JAX to avoid the pad entirely.
        xf = jnp.pad(xf, (0, lane_pad))
        yf = jnp.pad(yf, (0, lane_pad))

    rows = (n + _LANES - 1) // _LANES

    # Sublane alignment depends on dtype packing (f32: 8, bf16: 16, int8: 32).
    itemsize = jnp.dtype(x.dtype).itemsize
    sublane_mult = max(8, 8 * (4 // max(itemsize, 1)))
    if rows >= _MAX_TILE_ROWS:
        tile_rows = _MAX_TILE_ROWS
    else:
        tile_rows = -(-rows // sublane_mult) * sublane_mult

    num_blocks = -(-rows // tile_rows)
    num_cores = _NUM_CORES if num_blocks >= _NUM_CORES else 1
    blocks_per_core = -(-num_blocks // num_cores)
    last_block = num_blocks - 1

    x2 = xf.reshape(rows, _LANES)
    y2 = yf.reshape(rows, _LANES)
    eps_arr = jnp.asarray([eps], dtype=jnp.float32)

    def data_map(c, i):
        # Clamp out-of-range slots (odd num_blocks with 2 cores) onto the last
        # real block; the kernel masks their contribution to zero.
        return (jnp.minimum(c * blocks_per_core + i, last_block), 0)

    kernel = functools.partial(
        _charbonnier_partial_kernel,
        tile_rows=tile_rows,
        blocks_per_core=blocks_per_core,
        rows_valid=rows,
    )

    partials = pl.pallas_call(
        kernel,
        out_shape=jax.ShapeDtypeStruct((num_cores * _ACC_ROWS, _LANES), jnp.float32),
        grid_spec=pltpu.PrefetchScalarGridSpec(
            num_scalar_prefetch=0,
            grid=(num_cores, blocks_per_core),
            in_specs=[
                pl.BlockSpec(memory_space=pltpu.MemorySpace.SMEM),   # eps scalar
                pl.BlockSpec((tile_rows, _LANES), data_map),
                pl.BlockSpec((tile_rows, _LANES), data_map),
            ],
            out_specs=pl.BlockSpec((_ACC_ROWS, _LANES), lambda c, i: (c, 0)),
        ),
        compiler_params=pltpu.CompilerParams(
            # TODO(synk): on v7x verify in xprof that the leading axis really
            # shards across both TCs; switch to pltpu.CORE_PARALLEL if it doesn't.
            dimension_semantics=("parallel", "arbitrary"),
        ),
    )(eps_arr, x2, y2)

    # Lane-padded elements (diff == 0) each contribute exactly |eps|.
    eps_abs = jnp.abs(jnp.float32(eps))
    total = jnp.sum(partials) - jnp.float32(lane_pad) * eps_abs
    return total / jnp.float32(n)


if __name__ == "__main__":
    key = jax.random.PRNGKey(0)

    def ref_loss(x, y, eps):
        d = x.astype(jnp.float32) - y.astype(jnp.float32)
        return jnp.mean(jnp.sqrt(d * d + jnp.float32(eps) * jnp.float32(eps)))

    # NCHW input like the PyTorch module would receive.
    kx, ky = jax.random.split(key)
    x = jax.random.normal(kx, (2, 4, 16, 16), dtype=jnp.float32)
    y = jax.random.normal(ky, (2, 4, 16, 16), dtype=jnp.float32)
    for eps in (1e-3, 5e-2):   # runtime-eps path: no recompile between the two
        loss = jax.block_until_ready(charbonnier_loss(x, y, eps=eps))
        ref = ref_loss(x, y, eps)
        assert jnp.allclose(loss, ref, rtol=2e-5, atol=1e-6), (eps, loss, ref)

    # Ragged case: n not a multiple of 128 (lane pad + in-kernel row mask).
    kx, ky = jax.random.split(jax.random.fold_in(key, 1))
    xr = jax.random.normal(kx, (2, 3, 7, 11), dtype=jnp.float32)
    yr = jax.random.normal(ky, (2, 3, 7, 11), dtype=jnp.float32)
    loss_r = jax.block_until_ready(charbonnier_loss(xr, yr))
    assert jnp.allclose(loss_r, ref_loss(xr, yr, 1e-3), rtol=2e-5, atol=1e-6)

    # Multi-block case with an odd block count: exercises the 2-core split,
    # the boundary-block mask and the clamped out-of-range slot.
    kx, ky = jax.random.split(jax.random.fold_in(key, 2))
    xb = jax.random.normal(kx, (5000 * 128,), dtype=jnp.float32)
    yb = jax.random.normal(ky, (5000 * 128,), dtype=jnp.float32)
    loss_b = jax.block_until_ready(charbonnier_loss(xb, yb))
    assert jnp.allclose(loss_b, ref_loss(xb, yb, 1e-3), rtol=5e-5, atol=1e-6)

    print("KERNEL_OK")
</pallas_src>

<mosaic_0001>
module attributes {stable_mosaic.version = 11 : i64} {
  func.func @_charbonnier_partial_kernel(%arg0: i32, %arg1: i32, %arg2: memref<1xf32, #tpu.memory_space<smem>>, %arg3: memref<16x128xf32, #tpu.memory_space<vmem>>, %arg4: memref<16x128xf32, #tpu.memory_space<vmem>>, %arg5: memref<8x128xf32, #tpu.memory_space<vmem>>) attributes {dimension_semantics = [#tpu.dimension_semantics<parallel>, #tpu.dimension_semantics<arbitrary>], iteration_bounds = array<i64: 1, 1>, scalar_prefetch = 0 : i64, scratch_operands = 0 : i64, tpu.core_type = #tpu.core_type<tc>, window_params = [{transform_indices = @transform_0, window_bounds = array<i64: 1>}, {transform_indices = @transform_1, window_bounds = array<i64: 16, 128>}, {transform_indices = @transform_2, window_bounds = array<i64: 16, 128>}, {transform_indices = @transform_3, window_bounds = array<i64: 8, 128>}]} {
    %c0_i32 = arith.constant 0 : i32
    %0 = arith.cmpi eq, %arg1, %c0_i32 : i32
    %1 = arith.extui %0 : i1 to i32
    %c0_i32_0 = arith.constant 0 : i32
    %2 = arith.cmpi ne, %1, %c0_i32_0 : i32
    scf.if %2 {
      %cst = arith.constant 0.000000e+00 : f32
      %22 = vector.broadcast %cst : f32 to vector<8x128xf32>
      %c0_9 = arith.constant 0 : index
      %c0_10 = arith.constant 0 : index
      %23 = vector.load %arg5[%c0_9, %c0_10] : memref<8x128xf32, #tpu.memory_space<vmem>>, vector<8x128xf32>
      tpu.vector_store %arg5[%c0_9, %c0_10], %22 {strides = array<i32>} : memref<8x128xf32, #tpu.memory_space<vmem>>, vector<8x128xf32>,
    } else {
    }
    %c0 = arith.constant 0 : index
    %3 = memref.load %arg2[%c0] : memref<1xf32, #tpu.memory_space<smem>>
    %c0_1 = arith.constant 0 : index
    %c0_2 = arith.constant 0 : index
    %4 = vector.load %arg3[%c0_1, %c0_2] : memref<16x128xf32, #tpu.memory_space<vmem>>, vector<16x128xf32>
    %c0_3 = arith.constant 0 : index
    %c0_4 = arith.constant 0 : index
    %5 = vector.load %arg4[%c0_3, %c0_4] : memref<16x128xf32, #tpu.memory_space<vmem>>, vector<16x128xf32>
    %6 = arith.subf %4, %5 : vector<16x128xf32>
    %7 = arith.mulf %6, %6 : vector<16x128xf32>
    %8 = arith.mulf %3, %3 : f32
    %9 = vector.broadcast %8 : f32 to vector<16x128xf32>
    %10 = arith.addf %7, %9 : vector<16x128xf32>
    %11 = math.sqrt %10 : vector<16x128xf32>
    %c1_i32 = arith.constant 1 : i32
    %12 = arith.muli %arg0, %c1_i32 : i32
    %13 = arith.addi %12, %arg1 : i32
    %c16_i32 = arith.constant 16 : i32
    %14 = arith.muli %13, %c16_i32 : i32
    %c16_i32_5 = arith.constant 16 : i32
    %15 = arith.addi %14, %c16_i32_5 : i32
    %c16_i32_6 = arith.constant 16 : i32
    %16 = arith.cmpi sle, %15, %c16_i32_6 : i32
    %17 = arith.extui %16 : i1 to i32
    %c0_i32_7 = arith.constant 0 : i32
    %18 = arith.cmpi ne, %17, %c0_i32_7 : i32
    scf.if %18 {
      %c0_9 = arith.constant 0 : index
      %c0_10 = arith.constant 0 : index
      %22 = vector.load %arg5[%c0_9, %c0_10] : memref<8x128xf32, #tpu.memory_space<vmem>>, vector<8x128xf32>
      %23 = vector.shape_cast %11 : vector<16x128xf32> to vector<2x8x128xf32>
      %cst = arith.constant dense<0.000000e+00> : vector<8x128xf32>
      %24 = vector.multi_reduction <add>, %23, %cst [0] : vector<2x8x128xf32> to vector<8x128xf32>
      %25 = arith.addf %22, %24 : vector<8x128xf32>
      %c0_11 = arith.constant 0 : index
      %c0_12 = arith.constant 0 : index
      %26 = vector.load %arg5[%c0_11, %c0_12] : memref<8x128xf32, #tpu.memory_space<vmem>>, vector<8x128xf32>
      tpu.vector_store %arg5[%c0_11, %c0_12], %25 {strides = array<i32>} : memref<8x128xf32, #tpu.memory_space<vmem>>, vector<8x128xf32>,
    } else {
    }
    %true = arith.constant true
    %19 = arith.xori %16, %true : i1
    %20 = arith.extui %19 : i1 to i32
    %c0_i32_8 = arith.constant 0 : i32
    %21 = arith.cmpi ne, %20, %c0_i32_8 : i32
    scf.if %21 {
      %22 = tpu.iota {dimensions = array<i32: 0>} : vector<16x128xi32>
      %23 = vector.broadcast %14 : i32 to vector<16x128xi32>
      %24 = arith.addi %23, %22 : vector<16x128xi32>
      %c16_i32_9 = arith.constant 16 : i32
      %25 = vector.broadcast %c16_i32_9 : i32 to vector<16x128xi32>
      %26 = arith.cmpi slt, %24, %25 : vector<16x128xi32>
      %cst = arith.constant 0.000000e+00 : f32
      %27 = vector.broadcast %cst : f32 to vector<16x128xf32>
      %28 = arith.select %26, %11, %27 : vector<16x128xi1>, vector<16x128xf32>
      %c0_10 = arith.constant 0 : index
      %c0_11 = arith.constant 0 : index
      %29 = vector.load %arg5[%c0_10, %c0_11] : memref<8x128xf32, #tpu.memory_space<vmem>>, vector<8x128xf32>
      %30 = vector.shape_cast %28 : vector<16x128xf32> to vector<2x8x128xf32>
      %cst_12 = arith.constant dense<0.000000e+00> : vector<8x128xf32>
      %31 = vector.multi_reduction <add>, %30, %cst_12 [0] : vector<2x8x128xf32> to vector<8x128xf32>
      %32 = arith.addf %29, %31 : vector<8x128xf32>
      %c0_13 = arith.constant 0 : index
      %c0_14 = arith.constant 0 : index
      %33 = vector.load %arg5[%c0_13, %c0_14] : memref<8x128xf32, #tpu.memory_space<vmem>>, vector<8x128xf32>
      tpu.vector_store %arg5[%c0_13, %c0_14], %32 {strides = array<i32>} : memref<8x128xf32, #tpu.memory_space<vmem>>, vector<8x128xf32>,
    } else {
    }
    return
  }
  func.func @transform_0(%arg0: i32, %arg1: i32) -> i32 {
    %c0_i32 = arith.constant 0 : i32
    %c0_i32_0 = arith.constant 0 : i32
    return %c0_i32 : i32
  }
  func.func @transform_1(%arg0: i32, %arg1: i32) -> (i32, i32) {
    %c1_i32 = arith.constant 1 : i32
    %0 = arith.muli %arg0, %c1_i32 : i32
    %1 = arith.addi %0, %arg1 : i32
    %c0_i32 = arith.constant 0 : i32
    %2 = arith.minsi %1, %c0_i32 : i32
    %c0_i32_0 = arith.constant 0 : i32
    %c0_i32_1 = arith.constant 0 : i32
    return %2, %c0_i32_0 : i32, i32
  }
  func.func @transform_2(%arg0: i32, %arg1: i32) -> (i32, i32) {
    %c1_i32 = arith.constant 1 : i32
    %0 = arith.muli %arg0, %c1_i32 : i32
    %1 = arith.addi %0, %arg1 : i32
    %c0_i32 = arith.constant 0 : i32
    %2 = arith.minsi %1, %c0_i32 : i32
    %c0_i32_0 = arith.constant 0 : i32
    %c0_i32_1 = arith.constant 0 : i32
    return %2, %c0_i32_0 : i32, i32
  }
  func.func @transform_3(%arg0: i32, %arg1: i32) -> (i32, i32) {
    %c0_i32 = arith.constant 0 : i32
    %c0_i32_0 = arith.constant 0 : i32
    return %arg0, %c0_i32 : i32, i32
  }
}

</mosaic_0001>

<bundles_post_ra>
// kernel: tpu_custom_call.1
= control target key start
LH: loop header
LB: loop body
LE: loop exit
PB: predicated region body
PF: predicated region fallthrough
CT: control target
= control target key end

     0   :  { %9 = vsyncpa [#allocation4], 0  ;;  %s292_s0 = inlined_call_operand.<no memory space> [shape: f32[1], index: 0, kind: input, shape index: {}]   ;;  %s293_s1 = inlined_call_operand.hbm [shape: f32[16,128], index: 1, kind: input, shape index: {}]   ;;  %s294_s2 = inlined_call_operand.hbm [shape: f32[16,128], index: 2, kind: input, shape index: {}]   ;;  %s295_s3 = inlined_call_operand.hbm [shape: f32[8,128], index: 3, kind: output, shape index: {}]  }
   0x1   :  { %10 = vsyncpa [#allocation7], 0 }
   0x2   :  { %11 = vsyncpa [#allocation5], 0  ;;  %s227_s12 = smov [#allocation3]   ;;  %s155_s16 = scalar_lea.hbm %s293_s1, 256 }
   0x3   :  { %s25_s13 = sshll.u32 %s227_s12, 4  ;;  %p156_p0 = scmp.ne.s32.totalorder %s293_s1, %s155_s16  ;;  %s26_s13 = int_to_ptr.vmem [resolvable:$true] %s25_s13 }
   0x4   :  { %p159_p1 = scmp.lt.u32.totalorder %s155_s16, %s293_s1 }
   0x6   :  { %p161_p2 = pnand %p159_p1, %p156_p0 }
   0x8   :  { %164 = shalt.err (!%p161_p2)
}
   0x9   :  { %s165_s21 = scalar_lea.vmem %s26_s13, 256  ;;  %p170_p4 = scmp.lt.s32.totalorder %s26_s13, %s26_s13 }
   0xa   :  { %p166_p3 = scmp.ne.s32.totalorder %s26_s13, %s165_s21  ;;  %p171_p5 = scmp.lt.s32.totalorder %s165_s21, %s165_s21 }
   0xc   :  { %p172_p6 = por %p171_p5, %p170_p4 }
   0xe   :  { %p173_p7 = pnand %p172_p6, %p166_p3 }
  0x10   :  { %176 = shalt.err (!%p173_p7)
}
  0x11   :  { %s228_s22 = smov 128   ;;  %s229_s23 = smov 8  }
  0x12   :  { %31 = dma.hbm_to_vmem [thread:$0]  %s293_s1, 256, %s26_s13, [#allocation4], %s228_s22, %s228_s22, %s229_s23  }
  0x13   :  { %s230_s26 = smov [#allocation6]   ;;  %s177_s30 = scalar_lea.hbm %s294_s2, 256 }
  0x14   :  { %s43_s27 = sshll.u32 %s230_s26, 4  ;;  %p178_p8 = scmp.ne.s32.totalorder %s294_s2, %s177_s30  ;;  %s44_s27 = int_to_ptr.vmem [resolvable:$true] %s43_s27 }
  0x15   :  { %p181_p9 = scmp.lt.u32.totalorder %s177_s30, %s294_s2 }
  0x17   :  { %p183_p10 = pnand %p181_p9, %p178_p8 }
  0x19   :  { %186 = shalt.err (!%p183_p10)
}
  0x1a   :  { %s187_s8 = scalar_lea.vmem %s44_s27, 256  ;;  %p192_p12 = scmp.lt.s32.totalorder %s44_s27, %s44_s27 }
  0x1b   :  { %p188_p11 = scmp.ne.s32.totalorder %s44_s27, %s187_s8  ;;  %p193_p13 = scmp.lt.s32.totalorder %s187_s8, %s187_s8 }
  0x1d   :  { %p194_p0 = por %p193_p13, %p192_p12 }
  0x1f   :  { %p195_p1 = pnand %p194_p0, %p188_p11 }
  0x21   :  { %198 = shalt.err (!%p195_p1)
}
  0x22   :  { %49 = dma.hbm_to_vmem [thread:$0]  %s294_s2, 256, %s44_s27, [#allocation7], %s228_s22, %s228_s22, %s229_s23  }
  0x23   :  { %221 = dma.done.wait [#allocation4], 256  }
  0x24   :  { %222 = vsyncadd [#allocation4], 4294967040 }
  0x25   :  { %223 = dma.done.wait [#allocation7], 256  }
  0x26   :  { %224 = vsyncadd [#allocation7], 4294967040  ;;  %s78_s12 = smul.f32 %s292_s0, %s292_s0  ;;  %v70_v0 = vld [vmem:[#allocation3] sm:$0xff]  ;;  %v71_v1 = vld [vmem:[#allocation3 + $0x8] sm:$0xff]  ;;  %s231_s0 = smov [#allocation8]  }
  0x27   :  { %v72_v2 = vld [vmem:[#allocation6] sm:$0xff]  ;;  %v73_v3 = vld [vmem:[#allocation6 + $0x8] sm:$0xff]  ;;  %s131_s2 = sshll.u32 %s231_s0, 4  ;;  %s132_s2 = int_to_ptr.vmem [resolvable:$true] %s131_s2 }
  0x28   :  { %v74_v4 = vsub.f32 %v70_v0, %v72_v2  ;;  %v75_v5 = vsub.f32 %v71_v1, %v73_v3  ;;  %v79_v6 = vstv %s78_s12  ;;  %s199_s13 = scalar_lea.vmem %s132_s2, 128  ;;  %p204_p3 = scmp.lt.s32.totalorder %s132_s2, %s132_s2 }
  0x29   :  { %p200_p2 = scmp.ne.s32.totalorder %s132_s2, %s199_s13  ;;  %p205_p4 = scmp.lt.s32.totalorder %s199_s13, %s199_s13 }
  0x2a   :  { %v76_v7 = vmul.f32 %v74_v4, %v74_v4  ;;  %v77_v8 = vmul.f32 %v75_v5, %v75_v5 }
  0x2b   :  { %p206_p5 = por %p205_p4, %p204_p3 }
  0x2c   :  { %v80_v9 = vadd.f32 %v79_v6, %v76_v7  ;;  %v81_v10 = vadd.f32 %v79_v6, %v77_v8 }
  0x2d   :  { %p207_p6 = pnand %p206_p5, %p200_p2 }
  0x2e   :  { %151 = vrsqrt.f32 %v80_v9  ;;  %vm84_vm0 = vcmp.eq.f32.partialorder %v80_v9, inf  ;;  %v87_v12 = vand.u32 2147483648, %v80_v9  ;;  %vm86_vm1 = vcmp.eq.f32.partialorder %v80_v9, 0.0 }
  0x2f   :  { %153 = vrsqrt.f32 %v81_v10  ;;  %vm91_vm2 = vcmp.eq.f32.partialorder %v81_v10, inf  ;;  %v94_v15 = vand.u32 2147483648, %v81_v10  ;;  %vm93_vm3 = vcmp.eq.f32.partialorder %v81_v10, 0.0 }
  0x38   :  { %v152_v11 = vpop.eup %151 }
  0x39   :  { %v154_v13 = vpop.eup %153  ;;  %v83_v14 = vmul.f32 %v152_v11, %v80_v9 }
  0x3a   :  { %v90_v16 = vmul.f32 %v154_v13, %v81_v10 }
  0x3b   :  { %v85_v17 = vsel %vm84_vm0, %v80_v9, %v83_v14 }
  0x3c   :  { %v88_v18 = vsel %vm86_vm1, %v87_v12, %v85_v17  ;;  %v92_v19 = vsel %vm91_vm2, %v81_v10, %v90_v16 }
  0x3d   :  { %v95_v20 = vsel %vm93_vm3, %v94_v15, %v92_v19 }
  0x3e   :  { %v104_v21 = vadd.f32 %v95_v20, %v88_v18 }
  0x40   :  { %106 = vst [vmem:[#allocation8] sm:$0xff] %v104_v21 }
  0x41   :  { %210 = shalt.err (!%p207_p6)
}
  0x42   :  { %s211_s16 = scalar_lea.hbm %s295_s3, 128 }
  0x43   :  { %p212_p7 = scmp.ne.s32.totalorder %s295_s3, %s211_s16  ;;  %p215_p8 = scmp.lt.u32.totalorder %s211_s16, %s295_s3 }
  0x45   :  { %p217_p9 = pnand %p215_p8, %p212_p7 }
  0x47   :  { %220 = shalt.err (!%p217_p9)
}
  0x48   :  { %134 = dma.vmem_to_hbm [thread:$0]  %s132_s2, 128, %s295_s3, [#allocation5]  }
  0x49   :  { %225 = dma.done.wait [#allocation5], 128  }
  0x4a   :  { %226 = vsyncadd [#allocation5], 4294967168 }
  0x4b   :  { %138 = vsyncpa [#allocation4], 1 }
  0x4c   :  { %139 = vsyncpa [#allocation7], 1 }
  0x4d   :  { %140 = vsyncpa [#allocation5], 1 }

</bundles_post_ra>
